<compile_context>
chip_gen: v5e
topology: v5e:2x2
jax: 0.10.0
libtpu: 0.0.40
codegen_flags: <defaults>
</compile_context>

<pallas_src>
import jax
import jax.numpy as jnp
from jax.experimental import pallas as pl
from jax.experimental.pallas import tpu as pltpu


_LANE = 128
_VMEM_CAP_BYTES = 48 << 20  # headroom under v7x's 64 MiB physical VMEM


def _round_up(x, m):
    return (x + m - 1) // m * m


def _vmem_budget_bytes(tb, in_dim, hidden_dim, out_dim):
    """Padded-tile VMEM estimate for one grid step (lane-dense layout)."""
    f32 = 4
    stream = 2 * (in_dim + out_dim) * tb * f32   # double-buffered x_t / mu_t tiles
    temps = 2 * hidden_dim * tb * f32            # h and pre-tanh temporaries
    slush = 1 << 20                              # lane-padded params + compiler scratch
    return stream + temps + slush


def net_continuous_kernel(x_ref, w1_ref, b1_ref, w2_ref, b2_ref, mu_ref):
    # Transposed / lane-dense layout: batch on lanes, features on sublanes.
    #   x_ref : (in_dim, TB)     w1_ref: (H, in_dim)    b1_ref: (H, 1)
    #   w2_ref: (O, H)           b2_ref: (O, 1)         mu_ref: (O, TB)
    h = jnp.dot(w1_ref[...], x_ref[...], preferred_element_type=jnp.float32)
    h = jnp.maximum(h + b1_ref[...], 0.0)                      # (H, TB) + (H, 1)
    m = jnp.dot(w2_ref[...], h, preferred_element_type=jnp.float32)
    mu_ref[...] = jnp.tanh(m + b2_ref[...]).astype(mu_ref.dtype)  # full-lane store


def net_continuous_forward(x, w1, b1, w2, b2, action_log_std, *, block_batch=4096):
    """Pallas forward for Net_Continuous.

    x:              (B, input_dim)              f32
    w1:             (hidden_dim, input_dim)     (PyTorch [out, in] layout)
    b1:             (1, hidden_dim) or (hidden_dim,)
    w2:             (output_dim, hidden_dim)
    b2:             (1, output_dim) or (output_dim,)
    action_log_std: (1, output_dim)
    returns (mu, action_log_std_expanded), both (B, output_dim)
    """
    B, in_dim = x.shape
    hidden_dim = w1.shape[0]
    out_dim = w2.shape[0]

    # Batch tile: lanes-dense, so it must be a multiple of 128.
    tb = _round_up(min(block_batch, _round_up(B, _LANE)), _LANE)
    # Keep >=2 grid steps for batches >=256 so v7x megacore can shard the grid
    # (an extra step costs ~0.35 us; negligible on single-TC parts).
    if B >= 2 * _LANE:
        tb = min(tb, _round_up(pl.cdiv(B, 2), _LANE))
    # Shrink until the padded double-buffered footprint fits the VMEM cap.
    while tb > _LANE and _vmem_budget_bytes(tb, in_dim, hidden_dim, out_dim) > _VMEM_CAP_BYTES:
        tb = _round_up(tb // 2, _LANE)

    num_blocks = pl.cdiv(B, tb)
    b_padded = num_blocks * tb

    # Wrapper-side layout plumbing: transpose to batch-on-lanes and zero-pad the tail.
    x_t = x.T.astype(jnp.float32)                       # (in_dim, B)
    if b_padded != B:
        x_t = jnp.pad(x_t, ((0, 0), (0, b_padded - B)))
    b1c = jnp.reshape(b1, (hidden_dim, 1)).astype(jnp.float32)
    b2c = jnp.reshape(b2, (out_dim, 1)).astype(jnp.float32)

    budget = _vmem_budget_bytes(tb, in_dim, hidden_dim, out_dim)
    vmem_limit = int(min(_VMEM_CAP_BYTES, max(2 * budget, 32 << 20)))

    resident = lambda shape: pl.BlockSpec(shape, lambda i: (0, 0))  # stays in VMEM

    mu_t = pl.pallas_call(
        net_continuous_kernel,
        out_shape=jax.ShapeDtypeStruct((out_dim, b_padded), jnp.float32),
        grid=(num_blocks,),
        in_specs=[
            pl.BlockSpec((in_dim, tb), lambda i: (0, i)),   # batch-tiled activations
            resident((hidden_dim, in_dim)),
            resident((hidden_dim, 1)),
            resident((out_dim, hidden_dim)),
            resident((out_dim, 1)),
        ],
        out_specs=pl.BlockSpec((out_dim, tb), lambda i: (0, i)),   # lane-dense store
        compiler_params=pltpu.CompilerParams(
            dimension_semantics=("parallel",),
            vmem_limit_bytes=vmem_limit,
        ),
    )(x_t, w1, b1c, w2, b2c)

    mu = mu_t[:, :B].T                                   # back to (B, out_dim)
    # Constant parameter: broadcast outside the kernel (no compute, no extra DMA).
    log_std = jnp.broadcast_to(action_log_std, mu.shape)
    return mu, log_std


def init_params(key, input_dim, hidden_dim, output_dim):
    k1, k2, k3, k4 = jax.random.split(key, 4)
    # PyTorch init_weights(): weight ~ Normal(0, 0.01); biases keep default
    # nn.Linear init ~ U(-1/sqrt(fan_in), 1/sqrt(fan_in)).  Weights kept in
    # PyTorch [out_features, in_features] layout.
    w1 = (0.01 * jax.random.normal(k1, (hidden_dim, input_dim))).astype(jnp.float32)
    w2 = (0.01 * jax.random.normal(k2, (output_dim, hidden_dim))).astype(jnp.float32)
    b1_bound = 1.0 / jnp.sqrt(jnp.float32(input_dim))
    b2_bound = 1.0 / jnp.sqrt(jnp.float32(hidden_dim))
    b1 = jax.random.uniform(k3, (1, hidden_dim), minval=-b1_bound,
                            maxval=b1_bound).astype(jnp.float32)
    b2 = jax.random.uniform(k4, (1, output_dim), minval=-b2_bound,
                            maxval=b2_bound).astype(jnp.float32)
    action_log_std = jnp.zeros((1, output_dim), jnp.float32) - 2.0
    return w1, b1, w2, b2, action_log_std


def _reference(x, w1, b1, w2, b2, action_log_std):
    h = jnp.maximum(x @ w1.T + b1, 0.0)
    mu = jnp.tanh(h @ w2.T + b2)
    return mu, jnp.broadcast_to(action_log_std, mu.shape)


if __name__ == "__main__":
    input_dim, hidden_dim, output_dim = 16, 32, 8
    batch = 8

    key = jax.random.PRNGKey(0)
    kx, kp = jax.random.split(key)
    x = jax.random.normal(kx, (batch, input_dim), dtype=jnp.float32)
    w1, b1, w2, b2, action_log_std = init_params(kp, input_dim, hidden_dim, output_dim)

    # small-batch check (single grid step, padded to one 128-lane tile)
    mu, logstd = net_continuous_forward(x, w1, b1, w2, b2, action_log_std)
    jax.block_until_ready((mu, logstd))
    mu_ref, logstd_ref = _reference(x, w1, b1, w2, b2, action_log_std)
    assert mu.shape == (batch, output_dim) and logstd.shape == (batch, output_dim)
    assert jnp.allclose(mu, mu_ref, atol=1e-5), "mu mismatch (small batch)"
    assert jnp.allclose(logstd, logstd_ref, atol=1e-6), "log_std mismatch (small batch)"

    # multi-block check (exercises the batch grid + padding path, 3 grid steps)
    big_batch = 300  # deliberately not a multiple of the tile
    xb = jax.random.normal(jax.random.PRNGKey(1), (big_batch, input_dim),
                           dtype=jnp.float32)
    mu_b, logstd_b = net_continuous_forward(xb, w1, b1, w2, b2, action_log_std,
                                            block_batch=128)
    jax.block_until_ready((mu_b, logstd_b))
    mu_b_ref, logstd_b_ref = _reference(xb, w1, b1, w2, b2, action_log_std)
    assert jnp.allclose(mu_b, mu_b_ref, atol=1e-5), "mu mismatch (batched grid)"
    assert jnp.allclose(logstd_b, logstd_b_ref, atol=1e-6), "log_std mismatch (batched grid)"

    # default-tile check (larger batch, auto tile selection / megacore split path)
    mid_batch = 1000
    xm = jax.random.normal(jax.random.PRNGKey(2), (mid_batch, input_dim),
                           dtype=jnp.float32)
    mu_m, logstd_m = net_continuous_forward(xm, w1, b1, w2, b2, action_log_std)
    jax.block_until_ready((mu_m, logstd_m))
    mu_m_ref, logstd_m_ref = _reference(xm, w1, b1, w2, b2, action_log_std)
    assert jnp.allclose(mu_m, mu_m_ref, atol=1e-5), "mu mismatch (default tile)"
    assert jnp.allclose(logstd_m, logstd_m_ref, atol=1e-6), "log_std mismatch (default tile)"

    print("KERNEL_OK")
</pallas_src>

<mosaic_0001>
module attributes {stable_mosaic.version = 11 : i64} {
  func.func @net_continuous_kernel(%arg0: i32, %arg1: memref<16x128xf32, #tpu.memory_space<vmem>>, %arg2: memref<32x16xf32, #tpu.memory_space<vmem>>, %arg3: memref<32x1xf32, #tpu.memory_space<vmem>>, %arg4: memref<8x32xf32, #tpu.memory_space<vmem>>, %arg5: memref<8x1xf32, #tpu.memory_space<vmem>>, %arg6: memref<8x128xf32, #tpu.memory_space<vmem>>) attributes {dimension_semantics = [#tpu.dimension_semantics<parallel>], iteration_bounds = array<i64: 1>, scalar_prefetch = 0 : i64, scratch_operands = 0 : i64, tpu.core_type = #tpu.core_type<tc>, window_params = [{transform_indices = @transform_0, window_bounds = array<i64: 16, 128>}, {pipeline_mode = #tpu.pipeline_mode<synchronous>, transform_indices = @transform_1, window_bounds = array<i64: 32, 16>}, {pipeline_mode = #tpu.pipeline_mode<synchronous>, transform_indices = @transform_2, window_bounds = array<i64: 32, 1>}, {pipeline_mode = #tpu.pipeline_mode<synchronous>, transform_indices = @transform_3, window_bounds = array<i64: 8, 32>}, {pipeline_mode = #tpu.pipeline_mode<synchronous>, transform_indices = @transform_4, window_bounds = array<i64: 8, 1>}, {transform_indices = @transform_5, window_bounds = array<i64: 8, 128>}]} {
    %c0 = arith.constant 0 : index
    %c0_0 = arith.constant 0 : index
    %0 = vector.load %arg2[%c0, %c0_0] : memref<32x16xf32, #tpu.memory_space<vmem>>, vector<32x16xf32>
    %c0_1 = arith.constant 0 : index
    %c0_2 = arith.constant 0 : index
    %1 = vector.load %arg1[%c0_1, %c0_2] : memref<16x128xf32, #tpu.memory_space<vmem>>, vector<16x128xf32>
    %cst = arith.constant dense<0.000000e+00> : vector<32x128xf32>
    %2 = tpu.matmul %0, %1, %cst {dimension_numbers = #tpu.dot_dimension_numbers<[1], [0], [0], [1], [0, 0, 1, 1], [], []>} : vector<32x16xf32>, vector<16x128xf32>, vector<32x128xf32> -> vector<32x128xf32>
    %c0_3 = arith.constant 0 : index
    %c0_4 = arith.constant 0 : index
    %3 = vector.load %arg3[%c0_3, %c0_4] : memref<32x1xf32, #tpu.memory_space<vmem>>, vector<32x1xf32>
    %4 = vector.broadcast %3 : vector<32x1xf32> to vector<32x128xf32>
    %5 = arith.addf %2, %4 : vector<32x128xf32>
    %cst_5 = arith.constant 0.000000e+00 : f32
    %6 = vector.broadcast %cst_5 : f32 to vector<32x128xf32>
    %7 = arith.maximumf %5, %6 : vector<32x128xf32>
    %c0_6 = arith.constant 0 : index
    %c0_7 = arith.constant 0 : index
    %8 = vector.load %arg4[%c0_6, %c0_7] : memref<8x32xf32, #tpu.memory_space<vmem>>, vector<8x32xf32>
    %cst_8 = arith.constant dense<0.000000e+00> : vector<8x128xf32>
    %9 = tpu.matmul %8, %7, %cst_8 {dimension_numbers = #tpu.dot_dimension_numbers<[1], [0], [0], [1], [0, 0, 1, 1], [], []>} : vector<8x32xf32>, vector<32x128xf32>, vector<8x128xf32> -> vector<8x128xf32>
    %c0_9 = arith.constant 0 : index
    %c0_10 = arith.constant 0 : index
    %10 = vector.load %arg5[%c0_9, %c0_10] : memref<8x1xf32, #tpu.memory_space<vmem>>, vector<8x1xf32>
    %11 = vector.broadcast %10 : vector<8x1xf32> to vector<8x128xf32>
    %12 = arith.addf %9, %11 : vector<8x128xf32>
    %13 = math.tanh %12 : vector<8x128xf32>
    %c0_11 = arith.constant 0 : index
    %c0_12 = arith.constant 0 : index
    %14 = vector.load %arg6[%c0_11, %c0_12] : memref<8x128xf32, #tpu.memory_space<vmem>>, vector<8x128xf32>
    tpu.vector_store %arg6[%c0_11, %c0_12], %13 {strides = array<i32>} : memref<8x128xf32, #tpu.memory_space<vmem>>, vector<8x128xf32>,
    return
  }
  func.func @transform_0(%arg0: i32) -> (i32, i32) {
    %c0_i32 = arith.constant 0 : i32
    %c0_i32_0 = arith.constant 0 : i32
    return %c0_i32, %arg0 : i32, i32
  }
  func.func @transform_1(%arg0: i32) -> (i32, i32) {
    %c0_i32 = arith.constant 0 : i32
    %c0_i32_0 = arith.constant 0 : i32
    %c0_i32_1 = arith.constant 0 : i32
    return %c0_i32, %c0_i32_0 : i32, i32
  }
  func.func @transform_2(%arg0: i32) -> (i32, i32) {
    %c0_i32 = arith.constant 0 : i32
    %c0_i32_0 = arith.constant 0 : i32
    %c0_i32_1 = arith.constant 0 : i32
    return %c0_i32, %c0_i32_0 : i32, i32
  }
  func.func @transform_3(%arg0: i32) -> (i32, i32) {
    %c0_i32 = arith.constant 0 : i32
    %c0_i32_0 = arith.constant 0 : i32
    %c0_i32_1 = arith.constant 0 : i32
    return %c0_i32, %c0_i32_0 : i32, i32
  }
  func.func @transform_4(%arg0: i32) -> (i32, i32) {
    %c0_i32 = arith.constant 0 : i32
    %c0_i32_0 = arith.constant 0 : i32
    %c0_i32_1 = arith.constant 0 : i32
    return %c0_i32, %c0_i32_0 : i32, i32
  }
  func.func @transform_5(%arg0: i32) -> (i32, i32) {
    %c0_i32 = arith.constant 0 : i32
    %c0_i32_0 = arith.constant 0 : i32
    return %c0_i32, %arg0 : i32, i32
  }
}

</mosaic_0001>

<bundles_post_ra>
// kernel: tpu_custom_call.1
= control target key start
LH: loop header
LB: loop body
LE: loop exit
PB: predicated region body
PF: predicated region fallthrough
CT: control target
= control target key end

     0   :  { %vm51_vm0 = vcmask 130048   ;;  %v188_v4 = vmov 0   ;;  %s263_s0 = inlined_call_operand.vmem [shape: f32[16,128], index: 0, kind: input, shape index: {}]   ;;  %s264_s1 = inlined_call_operand.vmem [shape: f32[32,16], index: 1, kind: input, shape index: {}]   ;;  %s265_s2 = inlined_call_operand.vmem [shape: f32[32,1], index: 2, kind: input, shape index: {}]   ;;  %s266_s3 = inlined_call_operand.vmem [shape: f32[8,32], index: 3, kind: input, shape index: {}]   ;;  %s267_s4 = inlined_call_operand.vmem [shape: f32[8,1], index: 4, kind: input, shape index: {}]   ;;  %s268_s5 = inlined_call_operand.hbm [shape: f32[8,128], index: 5, kind: output, shape index: {}]  }
   0x1   :  { %v26_v0 = vld [vmem:[%s263_s0 + $0x8] sm:$0xff]  ;;  %v25_v1 = vld [vmem:[%s263_s0] sm:$0xff]  ;;  %v24_v3 = vld [vmem:[%s264_s1 + $0x18] sm:$0xff]  ;;  %157 = vset.pattern.permute.xlu0 %v188_v4 }
   0x2   :  { %151 = vmatpush.msra.mxu2 %v26_v0  ;;  %152 = vmatpush.msra.mxu3 %v26_v0  ;;  %v22_v2 = vld [vmem:[%s264_s1 + $0x8] sm:$0xff]  ;;  %v30_v5 = vld [vmem:[%s265_s2 + $0x18] sm:$0xff]  ;;  %v21_v6 = vld [vmem:[%s264_s1] sm:$0xff] }
   0x3   :  { %78 = vmatpush.msra.mxu0 %v26_v0 }
   0x4   :  { %153 = vmatpush.msra.mxu2 %v25_v1  ;;  %154 = vmatpush.msra.mxu3 %v25_v1 }
   0x5   :  { %10 = vsyncpa [#allocation3], 0  ;;  %147 = vmatmul.msk.f32.vlgmr.msra.gmra.mxu2 %vm51_vm0, %v22_v2  ;;  %149 = vmatmul.msk.f32.vlgmr.msra.gmra.mxu3 %vm51_vm0, %v24_v3  ;;  %v28_v7 = vld [vmem:[%s265_s2 + $0x8] sm:$0xff]  ;;  %v23_v8 = vld [vmem:[%s264_s1 + $0x10] sm:$0xff]  ;;  %vm104_vm1 = vcmask 261120   ;;  %s137_s17 = sshll.u32 %s268_s5, 4  ;;  %s138_s17 = int_to_ptr.hbm [resolvable:$true] %s137_s17 }
   0x6   :  { %48 = vperm.xlu0 %157, %v30_v5   ;;  %79 = vmatpush.msra.mxu0 %v25_v1  ;;  %v29_v9 = vld [vmem:[%s265_s2 + $0x10] sm:$0xff]  ;;  %v27_v10 = vld [vmem:[%s265_s2] sm:$0xff] }
   0x7   :  { %146 = vmatmul.msk.f32.vlgmr.msra.gmra.mxu0 %vm51_vm0, %v21_v6  ;;  %158 = vset.pattern.permute.xlu1 %v188_v4  ;;  %v98_v11 = vld [vmem:[%s267_s4] sm:$0xff]  ;;  %s189_s4 = smov [#allocation2]  }
   0x8   :  { %38 = vperm.xlu1 %158, %v28_v7   ;;  %159 = vset.pattern.permute.xlu2 %v188_v4  ;;  %v97_v28 = vld [vmem:[%s266_s3] sm:$0xff]  ;;  %s135_s14 = sshll.u32 %s189_s4, 4  ;;  %s136_s14 = int_to_ptr.vmem [resolvable:$true] %s135_s14 }
   0x9   :  { %101 = vperm.xlu2 %159, %v98_v11  }
   0xd   :  { %148 = vmatmul.msk.f32.gmra.mxu2 %vm51_vm0, %v23_v8 }
   0xe   :  { %43 = vperm.xlu0 %157, %v29_v9  }
  0x10   :  { %33 = vperm.xlu1 %158, %v27_v10  }
  0x63   :  { %v102_v29 = vpop.permute.xlu2 %101 }
  0x78   :  { %v49_v12 = vpop.permute.xlu0 %48 }
  0x7a   :  { %v39_v13 = vpop.permute.xlu1 %38 }
  0x80   :  { %v44_v18 = vpop.permute.xlu0 %43 }
  0x82   :  { %v34_v19 = vpop.permute.xlu1 %33 }
  0x84   :  { %v81_v20 = vpop.f32.mrf.mxu0 }
  0x85   :  { %v82_v24 = vadd.f32 %v81_v20, %v34_v19 }
  0x87   :  { %v93_v27 = vmax.f32 %v82_v24, 0.0 }
  0x88   :  { %v84_v14 = vpop.f32.mrf.mxu2  ;;  %v90_v15 = vpop.f32.mrf.mxu3 }
  0x89   :  { %v91_v16 = vadd.f32 %v90_v15, %v49_v12  ;;  %v85_v22 = vadd.f32 %v84_v14, %v39_v13 }
  0x8b   :  { %v96_v17 = vmax.f32 %v91_v16, 0.0  ;;  %v94_v26 = vmax.f32 %v85_v22, 0.0 }
  0x8d   :  { %120 = vmatpush.msra.mxu1 %v96_v17 }
  0x90   :  { %v87_v21 = vpop.f32.mrf.mxu2 }
  0x91   :  { %v88_v23 = vadd.f32 %v87_v21, %v44_v18 }
  0x93   :  { %v95_v25 = vmax.f32 %v88_v23, 0.0 }
  0x95   :  { %121 = vmatpush.msra.mxu1 %v95_v25 }
  0x97   :  { %122 = vmatpush.msra.mxu1 %v94_v26 }
  0x99   :  { %123 = vmatpush.msra.mxu1 %v93_v27 }
  0x9a   :  { %150 = vmatmul.msk.f32.vlgmr.msra.gmra.mxu1 %vm104_vm1, %v97_v28 }
 0x117   :  { %v125_v30 = vpop.f32.mrf.mxu1 }
 0x118   :  { %v126_v31 = vadd.f32 %v125_v30, %v102_v29 }
 0x11a   :  { %160 = vtanh.f32 %v126_v31 }
 0x120   :  { %v161_v32 = vpop.eup %160 }
 0x121   :  { %129 = vst [vmem:[#allocation2] sm:$0xff] %v161_v32 }
 0x122   :  { %140 = dma.vmem_to_hbm [thread:$0]  %s136_s14, 128, %s138_s17, [#allocation3]  }
 0x123   :  { %186 = dma.done.wait [#allocation3], 128  }
 0x124   :  { %187 = vsyncadd [#allocation3], 4294967168 }
 0x125   :  { %145 = vsyncpa [#allocation3], 1 }

</bundles_post_ra>
